<compile_context>
chip_gen: v6e
topology: v6e:2x2x1
jax: 0.10.0
libtpu: 0.0.40
codegen_flags: <defaults>
</compile_context>

<pallas_src>
import functools
import math

import jax
import jax.numpy as jnp
from jax.experimental import pallas as pl
from jax.experimental.pallas import tpu as pltpu

_SMALL_INPUT_BYTES = 256 * 1024  # below this, a plain-JAX add beats kernel launch cost


def make_pe(d_model: int, max_len: int = 5000) -> jnp.ndarray:
    """Deterministic sinusoidal positional-encoding buffer, shape (max_len, 1, d_model)."""
    position = jnp.arange(0, max_len, dtype=jnp.float32)[:, None]              # (max_len, 1)
    div_term = jnp.exp(
        jnp.arange(0, d_model, 2, dtype=jnp.float32) * -(math.log(10000.0) / d_model)
    )                                                                           # (d_model/2,)
    angles = position * div_term                                                # (max_len, d_model/2)
    pe = jnp.zeros((max_len, d_model), dtype=jnp.float32)
    pe = pe.at[:, 0::2].set(jnp.sin(angles))
    pe = pe.at[:, 1::2].set(jnp.cos(angles))
    # unsqueeze(0).transpose(0, 1) -> (max_len, 1, d_model)
    return pe[:, None, :]


def _choose_seq_tile(S: int, row_bytes: int, *,
                     target_tile_bytes: int = 4 * 1024 * 1024,
                     min_grid_steps: int = 4) -> int:
    """Sequence tile: ~target bytes of x per step, multiple of 8 sublanes (or the full
    extent when S < 8), and at least `min_grid_steps` grid steps when S allows so the
    double-buffer pipeline has a steady state and the axis can shard across cores."""
    ts = max(8, target_tile_bytes // max(1, row_bytes))
    if S >= min_grid_steps * 8:
        ts = min(ts, pl.cdiv(S, min_grid_steps))
    ts = min(ts, S)
    if S >= 8:
        ts = max(8, (ts // 8) * 8)
    return int(ts)


def _pos_enc_kernel(x_ref, pe_ref, o_ref, *, batch: int):
    # x_ref/o_ref: (ts, B*D) lane/sublane-dense tiles.  pe_ref: (ts, D) f32 tile.
    pe_t = pe_ref[...]                                             # (ts, D), f32
    if batch > 1:
        # Lane-axis repeat matches the (S, B*D) row layout: [d0..dD-1] x B per row.
        pe_t = jnp.concatenate([pe_t] * batch, axis=-1)            # (ts, B*D)
    # f32 accumulation via jnp promotion (matches PyTorch x + f32 buffer), then cast.
    o_ref[...] = (x_ref[...] + pe_t).astype(o_ref.dtype)


def positional_encoding(x: jnp.ndarray, pe: jnp.ndarray, *,
                        ts: int | None = None,
                        force_pallas: bool = False) -> jnp.ndarray:
    """x: (S, B, D), pe: (max_len, 1, D)  ->  (S, B, D) = x + pe[:S]."""
    S, B, D = x.shape
    max_len = pe.shape[0]
    assert S <= max_len, "sequence length exceeds the positional-encoding table"

    itemsize = jnp.dtype(x.dtype).itemsize
    out_dtype = jnp.promote_types(x.dtype, pe.dtype)   # PyTorch-style promotion vs f32 buffer

    # Fast path: tiny inputs are pure launch overhead for a Pallas kernel.
    if not force_pallas and S * B * D * itemsize < _SMALL_INPUT_BYTES:
        return (x + pe[:S]).astype(out_dtype)

    pe_s = pe[:S, 0, :]                                 # (S, D), f32, streamed per tile
    x2 = x.reshape(S, B * D)                            # free row-major merge of (B, D)

    if ts is None:
        ts = _choose_seq_tile(S, B * D * itemsize)
    ts = int(min(ts, S))
    grid = (pl.cdiv(S, ts),)

    out_itemsize = jnp.dtype(out_dtype).itemsize
    x_tile_bytes = ts * B * D * itemsize
    out_tile_bytes = ts * B * D * out_itemsize
    pe_tile_bytes = ts * D * 4
    vmem_needed = 2 * (x_tile_bytes + out_tile_bytes + pe_tile_bytes)   # double-buffered
    vmem_limit = int(min(64 * 1024 * 1024,
                         max(32 * 1024 * 1024, int(vmem_needed * 1.25))))

    cost = pl.CostEstimate(
        flops=S * B * D,
        transcendentals=0,
        bytes_accessed=S * B * D * itemsize + S * B * D * out_itemsize + S * D * 4,
    )

    out2 = pl.pallas_call(
        functools.partial(_pos_enc_kernel, batch=B),
        out_shape=jax.ShapeDtypeStruct((S, B * D), out_dtype),
        grid_spec=pltpu.PrefetchScalarGridSpec(
            num_scalar_prefetch=0,
            grid=grid,
            in_specs=[
                pl.BlockSpec((ts, B * D), lambda i: (i, 0)),   # x: streamed dense seq tiles
                pl.BlockSpec((ts, D), lambda i: (i, 0)),       # pe: streamed matching seq tiles
            ],
            out_specs=pl.BlockSpec((ts, B * D), lambda i: (i, 0)),
        ),
        compiler_params=pltpu.CompilerParams(
            dimension_semantics=("parallel",),
            vmem_limit_bytes=vmem_limit,
        ),
        cost_estimate=cost,
    )(x2, pe_s)

    return out2.reshape(S, B, D)


if __name__ == "__main__":
    MAX_LEN = 5000

    # Small shapes consistent with the module: seq=8, batch=2, d_model=32.
    S, B, D = 8, 2, 32
    key = jax.random.PRNGKey(0)
    x = jax.random.normal(key, (S, B, D), dtype=jnp.float32)
    pe = make_pe(D, MAX_LEN)
    ref = x + pe[:S]

    # Run the Pallas kernel on the small demo shape (forced past the fast path).
    out = jax.block_until_ready(positional_encoding(x, pe, force_pallas=True))
    assert out.shape == (S, B, D)
    assert jnp.allclose(out, ref, atol=1e-6), "Pallas kernel mismatch vs reference (small)"

    # Auto dispatch: tiny input takes the plain-JAX fast path.
    out_fast = jax.block_until_ready(positional_encoding(x, pe))
    assert jnp.allclose(out_fast, ref, atol=1e-6), "fast-path mismatch vs reference"

    # Larger shape exercising multiple grid steps and a partial trailing block.
    S2, B2, D2 = 600, 2, 256
    x2 = jax.random.normal(jax.random.PRNGKey(0), (S2, B2, D2), dtype=jnp.float32)
    pe2 = make_pe(D2, MAX_LEN)
    out2 = jax.block_until_ready(positional_encoding(x2, pe2))
    ref2 = x2 + pe2[:S2]
    assert jnp.allclose(out2, ref2, atol=1e-6), "Pallas kernel mismatch vs reference (large)"

    print("KERNEL_OK")
</pallas_src>

<mosaic_0001>
module attributes {stable_mosaic.version = 11 : i64} {
  func.func @_pos_enc_kernel(%arg0: i32, %arg1: memref<8x64xf32, #tpu.memory_space<vmem>>, %arg2: memref<8x32xf32, #tpu.memory_space<vmem>>, %arg3: memref<8x64xf32, #tpu.memory_space<vmem>>) attributes {dimension_semantics = [#tpu.dimension_semantics<parallel>], iteration_bounds = array<i64: 1>, scalar_prefetch = 0 : i64, scratch_operands = 0 : i64, tpu.core_type = #tpu.core_type<tc>, window_params = [{transform_indices = @transform_0, window_bounds = array<i64: 8, 64>}, {transform_indices = @transform_1, window_bounds = array<i64: 8, 32>}, {transform_indices = @transform_2, window_bounds = array<i64: 8, 64>}]} {
    %c0 = arith.constant 0 : index
    %c0_0 = arith.constant 0 : index
    %0 = vector.load %arg2[%c0, %c0_0] : memref<8x32xf32, #tpu.memory_space<vmem>>, vector<8x32xf32>
    %1 = tpu.concatenate %0, %0 in 1 : vector<8x32xf32>, vector<8x32xf32> -> vector<8x64xf32>
    %c0_1 = arith.constant 0 : index
    %c0_2 = arith.constant 0 : index
    %2 = vector.load %arg1[%c0_1, %c0_2] : memref<8x64xf32, #tpu.memory_space<vmem>>, vector<8x64xf32>
    %3 = arith.addf %2, %1 : vector<8x64xf32>
    %c0_3 = arith.constant 0 : index
    %c0_4 = arith.constant 0 : index
    %4 = vector.load %arg3[%c0_3, %c0_4] : memref<8x64xf32, #tpu.memory_space<vmem>>, vector<8x64xf32>
    tpu.vector_store %arg3[%c0_3, %c0_4], %3 {strides = array<i32>} : memref<8x64xf32, #tpu.memory_space<vmem>>, vector<8x64xf32>,
    return
  }
  func.func @transform_0(%arg0: i32) -> (i32, i32) {
    %c0_i32 = arith.constant 0 : i32
    %c0_i32_0 = arith.constant 0 : i32
    return %arg0, %c0_i32 : i32, i32
  }
  func.func @transform_1(%arg0: i32) -> (i32, i32) {
    %c0_i32 = arith.constant 0 : i32
    %c0_i32_0 = arith.constant 0 : i32
    return %arg0, %c0_i32 : i32, i32
  }
  func.func @transform_2(%arg0: i32) -> (i32, i32) {
    %c0_i32 = arith.constant 0 : i32
    %c0_i32_0 = arith.constant 0 : i32
    return %arg0, %c0_i32 : i32, i32
  }
}

</mosaic_0001>

<bundles_post_ra>
// kernel: tpu_custom_call.1
= control target key start
LH: loop header
LB: loop body
LE: loop exit
PB: predicated region body
PF: predicated region fallthrough
CT: control target
= control target key end

     0   :  { %7 = vsyncpa [#allocation3], 0  ;;  %s161_s0 = inlined_call_operand.hbm [shape: f32[8,64], index: 0, kind: input, shape index: {}]   ;;  %s162_s1 = inlined_call_operand.hbm [shape: f32[8,32], index: 1, kind: input, shape index: {}]   ;;  %s163_s2 = inlined_call_operand.hbm [shape: f32[8,64], index: 2, kind: output, shape index: {}]  }
   0x1   :  { %8 = vsyncpa [#allocation6], 0 }
   0x2   :  { %9 = vsyncpa [#allocation4], 0  ;;  %s133_s9 = smov [#allocation2]   ;;  %s134_s11 = smov [#allocation5]  }
   0x3   :  { %s16_s10 = sshll.u32 %s133_s9, 4  ;;  %s26_s12 = sshll.u32 %s134_s11, 4  ;;  %s17_s10 = int_to_ptr.vmem [resolvable:$true] %s16_s10  ;;  %s27_s12 = int_to_ptr.vmem [resolvable:$true] %s26_s12 }
   0x4   :  { %s75_s13 = scalar_lea.vmem %s17_s10, 128  ;;  %p80_p1 = scmp.lt.s32.totalorder %s17_s10, %s17_s10 }
   0x5   :  { %p76_p0 = scmp.ne.s32.totalorder %s17_s10, %s75_s13  ;;  %p81_p2 = scmp.lt.s32.totalorder %s75_s13, %s75_s13 }
   0x7   :  { %p82_p3 = por %p81_p2, %p80_p1 }
   0x9   :  { %p83_p4 = pnand %p82_p3, %p76_p0 }
   0xb   :  { %86 = shalt.err (!%p83_p4)
}
   0xc   :  { %19 = dma.hbm_to_vmem [thread:$0]  %s161_s0, 128, %s17_s10, [#allocation3]  }
   0xd   :  { %s95_s16 = scalar_lea.vmem %s27_s12, 128  ;;  %p100_p6 = scmp.lt.s32.totalorder %s27_s12, %s27_s12 }
   0xe   :  { %p96_p5 = scmp.ne.s32.totalorder %s27_s12, %s95_s16  ;;  %p101_p7 = scmp.lt.s32.totalorder %s95_s16, %s95_s16 }
  0x10   :  { %p102_p8 = por %p101_p7, %p100_p6 }
  0x12   :  { %p103_p9 = pnand %p102_p8, %p96_p5 }
  0x14   :  { %106 = shalt.err (!%p103_p9)
}
  0x15   :  { %29 = dma.hbm_to_vmem [thread:$0]  %s162_s1, 128, %s27_s12, [#allocation6]  }
  0x16   :  { %127 = dma.done.wait [#allocation3], 128  }
  0x17   :  { %128 = vsyncadd [#allocation3], 4294967168 }
  0x18   :  { %129 = dma.done.wait [#allocation6], 128  }
  0x19   :  { %130 = vsyncadd [#allocation6], 4294967168  ;;  %v36_v0 = vld [vmem:[#allocation5] sm:$0xff]  ;;  %s135_s19 = smov 32   ;;  %vm41_vm0 = vcmask 261120   ;;  %v43_v1 = vld [vmem:[#allocation2] sm:$0xff] }
  0x1a   :  { %38 = vrot.lane.b32.xlu0 %v36_v0, %s135_s19  ;;  %s136_s0 = smov [#allocation7]   ;;  %vm45_vm1 = vcmask 523264  }
  0x1b   :  { %s53_s20 = sshll.u32 %s136_s0, 4  ;;  %s54_s20 = int_to_ptr.vmem [resolvable:$true] %s53_s20 }
  0x1c   :  { %s107_s21 = scalar_lea.vmem %s54_s20, 128  ;;  %p112_p11 = scmp.lt.s32.totalorder %s54_s20, %s54_s20 }
  0x1d   :  { %p108_p10 = scmp.ne.s32.totalorder %s54_s20, %s107_s21  ;;  %p113_p12 = scmp.lt.s32.totalorder %s107_s21, %s107_s21 }
  0x1f   :  { %p114_p13 = por %p113_p12, %p112_p11 }
  0x21   :  { %p115_p0 = pnand %p114_p13, %p108_p10 }
  0x8c   :  { %v39_v2 = vpop.permute.xlu0 %38 }
  0x8d   :  { %v42_v3 = vsel %vm41_vm0, %v36_v0, %v39_v2 }
  0x8e   :  { %v44_v4 = vadd.f32 %v43_v1, %v42_v3 }
  0x90   :  { %46 = vst.msk [vmem:[#allocation7] sm:$0xff] %vm45_vm1, %v44_v4 }
  0x91   :  { %118 = shalt.err (!%p115_p0)
}
  0x92   :  { %56 = dma.vmem_to_hbm [thread:$0]  %s54_s20, 128, %s163_s2, [#allocation4]  }
  0x93   :  { %131 = dma.done.wait [#allocation4], 128  }
  0x94   :  { %132 = vsyncadd [#allocation4], 4294967168 }
  0x95   :  { %60 = vsyncpa [#allocation3], 1 }
  0x96   :  { %61 = vsyncpa [#allocation6], 1 }
  0x97   :  { %62 = vsyncpa [#allocation4], 1 }

</bundles_post_ra>
